<compile_context>
chip_gen: v7x
topology: tpu7x:2x2x1
jax: 0.10.0
libtpu: 0.0.40
codegen_flags: <defaults>
</compile_context>

<pallas_src>
import functools

import jax
import jax.numpy as jnp
from jax.experimental import pallas as pl
from jax.experimental.pallas import tpu as pltpu


def _mha_fused_kernel(q_ref, k_ref, v_ref, wq_ref, wk_ref, wv_ref,
                      wfc_ref, bfc_ref, mask_ref, o_ref,
                      *, heads, neg_fill):
    """One grid step == one batch element; all heads + fc_out inside the block.

    q_ref: (1, Sq, E)   k_ref/v_ref: (1, Sk, E)      (native layout)
    wq/wk/wv_ref: (E, E) block-diagonal per-head weights, pre-transposed to
                  (in, out); the 1/sqrt(E) scale is already folded into wq.
    wfc_ref: (E, E) pre-transposed (in, out); bfc_ref: (1, E)
    mask_ref: (1, 1, Sq, Sk)
    o_ref: (1, Sq, E) — final fc_out result, single lane-dense store.
    """
    e = q_ref.shape[2]
    d = e // heads

    qf = q_ref[0].astype(jnp.float32)        # (Sq, E)
    kf = k_ref[0].astype(jnp.float32)        # (Sk, E)
    vf = v_ref[0].astype(jnp.float32)        # (Sk, E)

    # Block-diagonal per-head projections: one MXU matmul each (all heads).
    qp = jnp.dot(qf, wq_ref[...], preferred_element_type=jnp.float32)  # (Sq, E)
    kp = jnp.dot(kf, wk_ref[...], preferred_element_type=jnp.float32)  # (Sk, E)
    vp = jnp.dot(vf, wv_ref[...], preferred_element_type=jnp.float32)  # (Sk, E)

    masked = mask_ref[0, 0] == 0             # (Sq, Sk), shared by all heads
    fill = jnp.float32(neg_fill)

    head_outs = []
    for h in range(heads):                   # static unroll; heads is small
        lo = h * d
        q_h = qp[:, lo:lo + d]               # (Sq, D) static lane slice
        k_h = kp[:, lo:lo + d]               # (Sk, D)
        v_h = vp[:, lo:lo + d]               # (Sk, D)

        # energy[q, k] = sum_d q_h[q, d] * k_h[k, d] — contract last dims
        # directly (MXU consumes the rhs orientation; no XLU .T).
        energy = jax.lax.dot_general(
            q_h, k_h, (((1,), (1,)), ((), ())),
            preferred_element_type=jnp.float32)          # (Sq, Sk)

        energy = jnp.where(masked, fill, energy)

        # softmax over the key axis, strictly f32 (scale already in qp).
        emax = jnp.max(energy, axis=-1, keepdims=True)
        p = jnp.exp(energy - emax)
        denom = jnp.sum(p, axis=-1, keepdims=True)
        attn = p * pl.reciprocal(denom, approx=False)

        head_outs.append(
            jnp.dot(attn, v_h, preferred_element_type=jnp.float32))  # (Sq, D)

    # Concatenate heads along the feature (lane) axis -> (Sq, E), then fuse
    # fc_out: no HBM round trip of the concat intermediate.
    concat = jnp.concatenate(head_outs, axis=-1)                      # (Sq, E)
    out = jnp.dot(concat, wfc_ref[...].astype(jnp.float32),
                  preferred_element_type=jnp.float32)
    out = out + bfc_ref[...].astype(jnp.float32)
    o_ref[0] = out.astype(o_ref.dtype)


def self_attention(value, key, query, mask, params, heads):
    """value/key/query: (N, S, E); mask: (N, 1, Sq, Sk) (0 = masked out)."""
    wq, wk, wv, w_fc, b_fc = params
    n, vl, embed = value.shape
    kl = key.shape[1]
    ql = query.shape[1]
    inv_scale = 1.0 / (float(embed) ** 0.5)

    # One-time wrapper prep (tiny (E, E) ops): block-diagonal per-head weights
    # in (in, out) orientation; fold the softmax scale into the Q weight.
    eye_h = jnp.eye(heads, dtype=jnp.float32)
    wq_blk = jnp.kron(eye_h, wq.T.astype(jnp.float32)) * jnp.float32(inv_scale)
    wk_blk = jnp.kron(eye_h, wk.T.astype(jnp.float32))
    wv_blk = jnp.kron(eye_h, wv.T.astype(jnp.float32))
    wfc_t = w_fc.T.astype(jnp.float32)
    b_fc2 = b_fc.reshape(1, embed).astype(jnp.float32)

    neg_fill = -1e20 * inv_scale  # masked_fill(-1e20) happens pre-scale in ref

    out = pl.pallas_call(
        functools.partial(_mha_fused_kernel, heads=heads, neg_fill=neg_fill),
        out_shape=jax.ShapeDtypeStruct((n, ql, embed), jnp.float32),
        grid=(n,),
        in_specs=[
            pl.BlockSpec((1, ql, embed), lambda b: (b, 0, 0)),
            pl.BlockSpec((1, kl, embed), lambda b: (b, 0, 0)),
            pl.BlockSpec((1, vl, embed), lambda b: (b, 0, 0)),
            pl.BlockSpec((embed, embed), lambda b: (0, 0)),   # Wq block-diag
            pl.BlockSpec((embed, embed), lambda b: (0, 0)),   # Wk block-diag
            pl.BlockSpec((embed, embed), lambda b: (0, 0)),   # Wv block-diag
            pl.BlockSpec((embed, embed), lambda b: (0, 0)),   # fc weight
            pl.BlockSpec((1, embed), lambda b: (0, 0)),       # fc bias
            pl.BlockSpec((1, 1, ql, kl), lambda b: (b, 0, 0, 0)),
        ],
        out_specs=pl.BlockSpec((1, ql, embed), lambda b: (b, 0, 0)),
        compiler_params=pltpu.CompilerParams(
            dimension_semantics=("parallel",),
            vmem_limit_bytes=32 * 1024 * 1024),
    )(query, key, value, wq_blk, wk_blk, wv_blk, wfc_t, b_fc2, mask)

    return out


def ref_self_attention(value, key, query, mask, params, heads):
    wq, wk, wv, w_fc, b_fc = params
    n, ql, embed = query.shape
    d = embed // heads
    qh = query.reshape(n, -1, heads, d)
    kh = key.reshape(n, -1, heads, d)
    vh = value.reshape(n, -1, heads, d)
    Q = jnp.einsum('nqhd,od->nqho', qh, wq)
    K = jnp.einsum('nkhd,od->nkho', kh, wk)
    V = jnp.einsum('nkhd,od->nkho', vh, wv)
    energy = jnp.einsum('nqhd,nkhd->nhqk', Q, K)
    energy = jnp.where(mask == 0, -1e20, energy)
    attn = jax.nn.softmax(energy / (embed ** 0.5), axis=3)
    out = jnp.einsum('nhqk,nkhd->nqhd', attn, V).reshape(n, ql, embed)
    return out @ w_fc.T + b_fc


if __name__ == "__main__":
    N, S, HEADS, EMBED = 2, 8, 2, 32
    D = EMBED // HEADS

    key0 = jax.random.PRNGKey(0)
    k1, k2, k3, k4, k5, k6, k7, k8 = jax.random.split(key0, 8)

    # Deterministic parameter init (shapes from nn.Linear in __init__).
    wq = 0.1 * jax.random.normal(k1, (D, D), jnp.float32)
    wk = 0.1 * jax.random.normal(k2, (D, D), jnp.float32)
    wv = 0.1 * jax.random.normal(k3, (D, D), jnp.float32)
    w_fc = 0.1 * jax.random.normal(k4, (EMBED, EMBED), jnp.float32)
    b_fc = 0.1 * jax.random.normal(k5, (EMBED,), jnp.float32)
    params = (wq, wk, wv, w_fc, b_fc)

    value = jax.random.normal(k6, (N, S, EMBED), jnp.float32)
    key_in = jax.random.normal(k7, (N, S, EMBED), jnp.float32)
    query = jax.random.normal(k8, (N, S, EMBED), jnp.float32)
    # Causal mask, broadcast over heads: (N, 1, Sq, Sk)
    mask = jnp.tril(jnp.ones((S, S), jnp.int32))[None, None].repeat(N, axis=0)

    out = self_attention(value, key_in, query, mask, params, HEADS)
    out = jax.block_until_ready(out)

    ref = ref_self_attention(value, key_in, query, mask, params, HEADS)
    assert out.shape == (N, S, EMBED)
    assert jnp.allclose(out, ref, rtol=1e-5, atol=1e-5), (
        float(jnp.max(jnp.abs(out - ref))))

    print("KERNEL_OK")
</pallas_src>

<mosaic_0001>
module attributes {stable_mosaic.version = 11 : i64} {
  func.func @_mha_fused_kernel(%arg0: i32, %arg1: memref<1x8x32xf32, #tpu.memory_space<vmem>>, %arg2: memref<1x8x32xf32, #tpu.memory_space<vmem>>, %arg3: memref<1x8x32xf32, #tpu.memory_space<vmem>>, %arg4: memref<32x32xf32, #tpu.memory_space<vmem>>, %arg5: memref<32x32xf32, #tpu.memory_space<vmem>>, %arg6: memref<32x32xf32, #tpu.memory_space<vmem>>, %arg7: memref<32x32xf32, #tpu.memory_space<vmem>>, %arg8: memref<1x32xf32, #tpu.memory_space<vmem>>, %arg9: memref<1x1x8x8xi32, #tpu.memory_space<vmem>>, %arg10: memref<1x8x32xf32, #tpu.memory_space<vmem>>) attributes {dimension_semantics = [#tpu.dimension_semantics<parallel>], iteration_bounds = array<i64: 2>, scalar_prefetch = 0 : i64, scratch_operands = 0 : i64, tpu.core_type = #tpu.core_type<tc>, window_params = [{transform_indices = @transform_0, window_bounds = array<i64: 1, 8, 32>}, {transform_indices = @transform_1, window_bounds = array<i64: 1, 8, 32>}, {transform_indices = @transform_2, window_bounds = array<i64: 1, 8, 32>}, {pipeline_mode = #tpu.pipeline_mode<synchronous>, transform_indices = @transform_3, window_bounds = array<i64: 32, 32>}, {pipeline_mode = #tpu.pipeline_mode<synchronous>, transform_indices = @transform_4, window_bounds = array<i64: 32, 32>}, {pipeline_mode = #tpu.pipeline_mode<synchronous>, transform_indices = @transform_5, window_bounds = array<i64: 32, 32>}, {pipeline_mode = #tpu.pipeline_mode<synchronous>, transform_indices = @transform_6, window_bounds = array<i64: 32, 32>}, {pipeline_mode = #tpu.pipeline_mode<synchronous>, transform_indices = @transform_7, window_bounds = array<i64: 1, 32>}, {transform_indices = @transform_8, window_bounds = array<i64: 1, 1, 8, 8>}, {transform_indices = @transform_9, window_bounds = array<i64: 1, 8, 32>}]} {
    %c0 = arith.constant 0 : index
    %c0_0 = arith.constant 0 : index
    %c0_1 = arith.constant 0 : index
    %0 = vector.load %arg1[%c0, %c0_0, %c0_1] : memref<1x8x32xf32, #tpu.memory_space<vmem>>, vector<1x8x32xf32>
    %1 = vector.shape_cast %0 : vector<1x8x32xf32> to vector<8x32xf32>
    %c0_2 = arith.constant 0 : index
    %c0_3 = arith.constant 0 : index
    %c0_4 = arith.constant 0 : index
    %2 = vector.load %arg2[%c0_2, %c0_3, %c0_4] : memref<1x8x32xf32, #tpu.memory_space<vmem>>, vector<1x8x32xf32>
    %3 = vector.shape_cast %2 : vector<1x8x32xf32> to vector<8x32xf32>
    %c0_5 = arith.constant 0 : index
    %c0_6 = arith.constant 0 : index
    %c0_7 = arith.constant 0 : index
    %4 = vector.load %arg3[%c0_5, %c0_6, %c0_7] : memref<1x8x32xf32, #tpu.memory_space<vmem>>, vector<1x8x32xf32>
    %5 = vector.shape_cast %4 : vector<1x8x32xf32> to vector<8x32xf32>
    %c0_8 = arith.constant 0 : index
    %c0_9 = arith.constant 0 : index
    %6 = vector.load %arg4[%c0_8, %c0_9] : memref<32x32xf32, #tpu.memory_space<vmem>>, vector<32x32xf32>
    %cst = arith.constant dense<0.000000e+00> : vector<8x32xf32>
    %7 = tpu.matmul %1, %6, %cst {dimension_numbers = #tpu.dot_dimension_numbers<[1], [0], [0], [1], [0, 0, 1, 1], [], []>} : vector<8x32xf32>, vector<32x32xf32>, vector<8x32xf32> -> vector<8x32xf32>
    %c0_10 = arith.constant 0 : index
    %c0_11 = arith.constant 0 : index
    %8 = vector.load %arg5[%c0_10, %c0_11] : memref<32x32xf32, #tpu.memory_space<vmem>>, vector<32x32xf32>
    %cst_12 = arith.constant dense<0.000000e+00> : vector<8x32xf32>
    %9 = tpu.matmul %3, %8, %cst_12 {dimension_numbers = #tpu.dot_dimension_numbers<[1], [0], [0], [1], [0, 0, 1, 1], [], []>} : vector<8x32xf32>, vector<32x32xf32>, vector<8x32xf32> -> vector<8x32xf32>
    %c0_13 = arith.constant 0 : index
    %c0_14 = arith.constant 0 : index
    %10 = vector.load %arg6[%c0_13, %c0_14] : memref<32x32xf32, #tpu.memory_space<vmem>>, vector<32x32xf32>
    %cst_15 = arith.constant dense<0.000000e+00> : vector<8x32xf32>
    %11 = tpu.matmul %5, %10, %cst_15 {dimension_numbers = #tpu.dot_dimension_numbers<[1], [0], [0], [1], [0, 0, 1, 1], [], []>} : vector<8x32xf32>, vector<32x32xf32>, vector<8x32xf32> -> vector<8x32xf32>
    %c0_16 = arith.constant 0 : index
    %c0_17 = arith.constant 0 : index
    %c0_18 = arith.constant 0 : index
    %c0_19 = arith.constant 0 : index
    %12 = vector.load %arg9[%c0_16, %c0_17, %c0_18, %c0_19] : memref<1x1x8x8xi32, #tpu.memory_space<vmem>>, vector<1x1x8x8xi32>
    %13 = vector.shape_cast %12 : vector<1x1x8x8xi32> to vector<8x8xi32>
    %c0_i32 = arith.constant 0 : i32
    %14 = vector.broadcast %c0_i32 : i32 to vector<8x8xi32>
    %15 = arith.cmpi eq, %13, %14 : vector<8x8xi32>
    %16 = vector.extract_strided_slice %7 {offsets = [0, 0], sizes = [8, 16], strides = [1, 1]} : vector<8x32xf32> to vector<8x16xf32>
    %17 = vector.extract_strided_slice %9 {offsets = [0, 0], sizes = [8, 16], strides = [1, 1]} : vector<8x32xf32> to vector<8x16xf32>
    %18 = vector.extract_strided_slice %11 {offsets = [0, 0], sizes = [8, 16], strides = [1, 1]} : vector<8x32xf32> to vector<8x16xf32>
    %cst_20 = arith.constant dense<0.000000e+00> : vector<8x8xf32>
    %19 = tpu.matmul %16, %17, %cst_20 {dimension_numbers = #tpu.dot_dimension_numbers<[1], [1], [0], [0], [0, 0, 1, 0], [], []>} : vector<8x16xf32>, vector<8x16xf32>, vector<8x8xf32> -> vector<8x8xf32>
    %cst_21 = arith.constant -1.76776698E+19 : f32
    %20 = vector.broadcast %cst_21 : f32 to vector<8x8xf32>
    %21 = arith.select %15, %20, %19 : vector<8x8xi1>, vector<8x8xf32>
    %cst_22 = arith.constant dense<0xFF800000> : vector<8xf32>
    %22 = vector.multi_reduction <maximumf>, %21, %cst_22 [1] : vector<8x8xf32> to vector<8xf32>
    %23 = vector.shape_cast %22 : vector<8xf32> to vector<8x1xf32>
    %24 = vector.broadcast %23 : vector<8x1xf32> to vector<8x8xf32>
    %25 = arith.subf %21, %24 : vector<8x8xf32>
    %26 = math.exp %25 : vector<8x8xf32>
    %cst_23 = arith.constant dense<0.000000e+00> : vector<8xf32>
    %27 = vector.multi_reduction <add>, %26, %cst_23 [1] : vector<8x8xf32> to vector<8xf32>
    %28 = vector.shape_cast %27 : vector<8xf32> to vector<8x1xf32>
    %29 = tpu.reciprocal %28 : vector<8x1xf32> -> vector<8x1xf32>
    %30 = vector.broadcast %29 : vector<8x1xf32> to vector<8x8xf32>
    %31 = arith.mulf %26, %30 : vector<8x8xf32>
    %cst_24 = arith.constant dense<0.000000e+00> : vector<8x16xf32>
    %32 = tpu.matmul %31, %18, %cst_24 {dimension_numbers = #tpu.dot_dimension_numbers<[1], [0], [0], [1], [0, 0, 1, 1], [], []>} : vector<8x8xf32>, vector<8x16xf32>, vector<8x16xf32> -> vector<8x16xf32>
    %33 = vector.extract_strided_slice %7 {offsets = [0, 16], sizes = [8, 16], strides = [1, 1]} : vector<8x32xf32> to vector<8x16xf32>
    %34 = vector.extract_strided_slice %9 {offsets = [0, 16], sizes = [8, 16], strides = [1, 1]} : vector<8x32xf32> to vector<8x16xf32>
    %35 = vector.extract_strided_slice %11 {offsets = [0, 16], sizes = [8, 16], strides = [1, 1]} : vector<8x32xf32> to vector<8x16xf32>
    %cst_25 = arith.constant dense<0.000000e+00> : vector<8x8xf32>
    %36 = tpu.matmul %33, %34, %cst_25 {dimension_numbers = #tpu.dot_dimension_numbers<[1], [1], [0], [0], [0, 0, 1, 0], [], []>} : vector<8x16xf32>, vector<8x16xf32>, vector<8x8xf32> -> vector<8x8xf32>
    %cst_26 = arith.constant -1.76776698E+19 : f32
    %37 = vector.broadcast %cst_26 : f32 to vector<8x8xf32>
    %38 = arith.select %15, %37, %36 : vector<8x8xi1>, vector<8x8xf32>
    %cst_27 = arith.constant dense<0xFF800000> : vector<8xf32>
    %39 = vector.multi_reduction <maximumf>, %38, %cst_27 [1] : vector<8x8xf32> to vector<8xf32>
    %40 = vector.shape_cast %39 : vector<8xf32> to vector<8x1xf32>
    %41 = vector.broadcast %40 : vector<8x1xf32> to vector<8x8xf32>
    %42 = arith.subf %38, %41 : vector<8x8xf32>
    %43 = math.exp %42 : vector<8x8xf32>
    %cst_28 = arith.constant dense<0.000000e+00> : vector<8xf32>
    %44 = vector.multi_reduction <add>, %43, %cst_28 [1] : vector<8x8xf32> to vector<8xf32>
    %45 = vector.shape_cast %44 : vector<8xf32> to vector<8x1xf32>
    %46 = tpu.reciprocal %45 : vector<8x1xf32> -> vector<8x1xf32>
    %47 = vector.broadcast %46 : vector<8x1xf32> to vector<8x8xf32>
    %48 = arith.mulf %43, %47 : vector<8x8xf32>
    %cst_29 = arith.constant dense<0.000000e+00> : vector<8x16xf32>
    %49 = tpu.matmul %48, %35, %cst_29 {dimension_numbers = #tpu.dot_dimension_numbers<[1], [0], [0], [1], [0, 0, 1, 1], [], []>} : vector<8x8xf32>, vector<8x16xf32>, vector<8x16xf32> -> vector<8x16xf32>
    %50 = tpu.concatenate %32, %49 in 1 : vector<8x16xf32>, vector<8x16xf32> -> vector<8x32xf32>
    %c0_30 = arith.constant 0 : index
    %c0_31 = arith.constant 0 : index
    %51 = vector.load %arg7[%c0_30, %c0_31] : memref<32x32xf32, #tpu.memory_space<vmem>>, vector<32x32xf32>
    %cst_32 = arith.constant dense<0.000000e+00> : vector<8x32xf32>
    %52 = tpu.matmul %50, %51, %cst_32 {dimension_numbers = #tpu.dot_dimension_numbers<[1], [0], [0], [1], [0, 0, 1, 1], [], []>} : vector<8x32xf32>, vector<32x32xf32>, vector<8x32xf32> -> vector<8x32xf32>
    %c0_33 = arith.constant 0 : index
    %c0_34 = arith.constant 0 : index
    %53 = vector.load %arg8[%c0_33, %c0_34] : memref<1x32xf32, #tpu.memory_space<vmem>>, vector<1x32xf32>
    %54 = vector.broadcast %53 : vector<1x32xf32> to vector<8x32xf32>
    %55 = arith.addf %52, %54 : vector<8x32xf32>
    %c0_35 = arith.constant 0 : index
    %c0_36 = arith.constant 0 : index
    %c0_37 = arith.constant 0 : index
    %56 = vector.load %arg10[%c0_35, %c0_36, %c0_37] : memref<1x8x32xf32, #tpu.memory_space<vmem>>, vector<1x8x32xf32>
    %57 = vector.shape_cast %56 : vector<1x8x32xf32> to vector<8x32xf32>
    %58 = vector.shape_cast %55 : vector<8x32xf32> to vector<1x8x32xf32>
    tpu.vector_store %arg10[%c0_35, %c0_36, %c0_37], %58 {strides = array<i32>} : memref<1x8x32xf32, #tpu.memory_space<vmem>>, vector<1x8x32xf32>,
    return
  }
  func.func @transform_0(%arg0: i32) -> (i32, i32, i32) {
    %c0_i32 = arith.constant 0 : i32
    %c0_i32_0 = arith.constant 0 : i32
    %c0_i32_1 = arith.constant 0 : i32
    return %arg0, %c0_i32, %c0_i32_0 : i32, i32, i32
  }
  func.func @transform_1(%arg0: i32) -> (i32, i32, i32) {
    %c0_i32 = arith.constant 0 : i32
    %c0_i32_0 = arith.constant 0 : i32
    %c0_i32_1 = arith.constant 0 : i32
    return %arg0, %c0_i32, %c0_i32_0 : i32, i32, i32
  }
  func.func @transform_2(%arg0: i32) -> (i32, i32, i32) {
    %c0_i32 = arith.constant 0 : i32
    %c0_i32_0 = arith.constant 0 : i32
    %c0_i32_1 = arith.constant 0 : i32
    return %arg0, %c0_i32, %c0_i32_0 : i32, i32, i32
  }
  func.func @transform_3(%arg0: i32) -> (i32, i32) {
    %c0_i32 = arith.constant 0 : i32
    %c0_i32_0 = arith.constant 0 : i32
    %c0_i32_1 = arith.constant 0 : i32
    return %c0_i32, %c0_i32_0 : i32, i32
  }
  func.func @transform_4(%arg0: i32) -> (i32, i32) {
    %c0_i32 = arith.constant 0 : i32
    %c0_i32_0 = arith.constant 0 : i32
    %c0_i32_1 = arith.constant 0 : i32
    return %c0_i32, %c0_i32_0 : i32, i32
  }
  func.func @transform_5(%arg0: i32) -> (i32, i32) {
    %c0_i32 = arith.constant 0 : i32
    %c0_i32_0 = arith.constant 0 : i32
    %c0_i32_1 = arith.constant 0 : i32
    return %c0_i32, %c0_i32_0 : i32, i32
  }
  func.func @transform_6(%arg0: i32) -> (i32, i32) {
    %c0_i32 = arith.constant 0 : i32
    %c0_i32_0 = arith.constant 0 : i32
    %c0_i32_1 = arith.constant 0 : i32
    return %c0_i32, %c0_i32_0 : i32, i32
  }
  func.func @transform_7(%arg0: i32) -> (i32, i32) {
    %c0_i32 = arith.constant 0 : i32
    %c0_i32_0 = arith.constant 0 : i32
    %c0_i32_1 = arith.constant 0 : i32
    return %c0_i32, %c0_i32_0 : i32, i32
  }
  func.func @transform_8(%arg0: i32) -> (i32, i32, i32, i32) {
    %c0_i32 = arith.constant 0 : i32
    %c0_i32_0 = arith.constant 0 : i32
    %c0_i32_1 = arith.constant 0 : i32
    %c0_i32_2 = arith.constant 0 : i32
    return %arg0, %c0_i32, %c0_i32_0, %c0_i32_1 : i32, i32, i32, i32
  }
  func.func @transform_9(%arg0: i32) -> (i32, i32, i32) {
    %c0_i32 = arith.constant 0 : i32
    %c0_i32_0 = arith.constant 0 : i32
    %c0_i32_1 = arith.constant 0 : i32
    return %arg0, %c0_i32, %c0_i32_0 : i32, i32, i32
  }
}

</mosaic_0001>

<bundles_post_ra>
// kernel: tpu_custom_call.1
= control target key start
LH: loop header
LB: loop body
LE: loop exit
PB: predicated region body
PF: predicated region fallthrough
CT: control target
= control target key end

     0   :  { %s2362_s0 = inlined_call_operand.hbm [shape: f32[2,8,32], index: 0, kind: input, shape index: {}]   ;;  %s2363_s1 = inlined_call_operand.hbm [shape: f32[2,8,32], index: 1, kind: input, shape index: {}]   ;;  %s2364_s2 = inlined_call_operand.hbm [shape: f32[2,8,32], index: 2, kind: input, shape index: {}]   ;;  %s2365_s3 = inlined_call_operand.hbm [shape: f32[32,32], index: 3, kind: input, shape index: {}]   ;;  %s2366_s4 = inlined_call_operand.hbm [shape: f32[32,32], index: 4, kind: input, shape index: {}]   ;;  %s2367_s5 = inlined_call_operand.hbm [shape: f32[32,32], index: 5, kind: input, shape index: {}]   ;;  %s2368_s6 = inlined_call_operand.hbm [shape: f32[32,32], index: 6, kind: input, shape index: {}]   ;;  %s2369_s7 = inlined_call_operand.vmem [shape: f32[1,32], index: 7, kind: input, shape index: {}]   ;;  %s2370_s8 = inlined_call_operand.vmem [shape: s32[2,1,8,8], index: 8, kind: input, shape index: {}]   ;;  %s2371_s9 = inlined_call_operand.hbm [shape: f32[2,8,32], index: 9, kind: output, shape index: {}]  }
   0x1   :  { %2397 = sst [smem:[#allocation26_spill]] %s2363_s1 }
   0x2   :  { %2398 = sst [smem:[#allocation27_spill]] %s2365_s3 }
   0x3   :  { %2399 = sst [smem:[#allocation28_spill]] %s2367_s5 }
   0x4   :  { %2400 = sst [smem:[#allocation29_spill]] %s2369_s7 }
   0x5   :  { %2401 = sst [smem:[#allocation30_spill]] %s2371_s9 }
   0x6   :  { %14 = vsyncpa [#allocation3], 0 }
   0x7   :  { %16 = vsyncpa [#allocation3 + $0x1], 0 }
   0x8   :  { %17 = vsyncpa [#allocation6], 0 }
   0x9   :  { %19 = vsyncpa [#allocation6 + $0x1], 0 }
   0xa   :  { %20 = vsyncpa [#allocation9], 0 }
   0xb   :  { %21 = vsyncpa [#allocation12], 0 }
   0xc   :  { %22 = vsyncpa [#allocation4], 0 }
   0xd   :  { %24 = vsyncpa [#allocation4 + $0x1], 0  ;;  %s1941_s30 = smov 0   ;;  %s1943_s10 = smov 0  }
   0xe   :  { %s1945_s11 = smov 0   ;;  %s1947_s12 = smov 0  }
   0xf LB: > { %2402 = sst [smem:[#allocation20_spill]] %s1862_s30  ;;  %s1876_s13 = smov [#allocation8]   ;;  %s1874_s12 = sphi %s1947_s12, %s2442_s12   ;;  %s1870_s11 = sphi %s1945_s11, %s2446_s11   ;;  %s1866_s10 = sphi %s1943_s10, %s2445_s10   ;;  %s1862_s30 = sphi %s1941_s30, %s2444_s30  }
  0x10   : > { %2403 = sst [smem:[#allocation21_spill]] %s1874_s12  ;;  %s282_s14 = sshll.u32 %s1876_s13, 4  ;;  %s1967_s14 = int_to_ptr.vmem [resolvable:$true] %s282_s14 }
  0x11   : > { %s1962_s15 = sadd.s32 4294967295, %s1874_s12   ;;  %p1329_p0 = scmp.ge.s32.totalorder %s1874_s12, 1 }
  0x12   : > { %p2383_p1 = scmp.eq.s32.totalorder %s1962_s15, 0  ;;  %p270_p2 = scmp.lt.s32.totalorder %s1874_s12, 3 }
  0x13   : > { %s1877_s17 = smov [#allocation11]   ;;  %s2406_s3 = sld [smem:[#allocation27_spill]] }
  0x14   : > { %p1969_p3 = pnand %p1329_p0, %p270_p2  ;;  %s308_s18 = sshll.u32 %s1877_s17, 4  ;;  %s1982_s18 = int_to_ptr.vmem [resolvable:$true] %s308_s18 }
  0x16   : > { %s2404_s16 = scalar_select %p1969_p3, 1, 0 }
  0x17   : > { %p1506_p5 = pneg %p1969_p3 }
  0x19   : > { %p1978_p6 = pnand %p1506_p5, %p2383_p1  ;;  %s1594_s22 = scalar_lea.hbm %s2406_s3, 512 }
  0x1a   : > { %p1595_p7 = scmp.ne.s32.totalorder %s2406_s3, %s1594_s22  ;;  %p1601_p11 = scmp.lt.u32.totalorder %s1594_s22, %s2406_s3 }
  0x1b   : > { %s2405_s19 = scalar_select %p1978_p6, 1, 0 }
  0x1c   : > { %p1992_p8 = pneg %p1978_p6 }
  0x1e   : > { %s2407_s25 = scalar_select %p1992_p8, 1, 0 }
  0x1f   : > { %p1597_p9 = pnand %p1992_p8, %p1595_p7 }
  0x21   : > { %p1598_p10 = pneg %p1597_p9 }
  0x23   : > { %p1603_p12 = pnand %p1601_p11, %p1598_p10 }
  0x25   : > { %1606 = shalt.err (!%p1603_p12)
}
  0x26   : > { %s1607_s28 = scalar_lea.vmem %s1967_s14, 512  ;;  %p1615_p5 = scmp.lt.s32.totalorder %s1967_s14, %s1967_s14 }
  0x27   : > { %p1608_p13 = scmp.ne.s32.totalorder %s1967_s14, %s1607_s28  ;;  %p1616_p4 = scmp.lt.s32.totalorder %s1607_s28, %s1607_s28 }
  0x29   : > { %p1610_p0 = pnand %p1608_p13, %p1992_p8  ;;  %p1617_p7 = por %p1616_p4, %p1615_p5 }
  0x2b   : > { %p1611_p2 = pneg %p1610_p0 }
  0x2d   : > { %p1618_p9 = pnand %p1617_p7, %p1611_p2 }
  0x2f   : > { %1621 = shalt.err (!%p1618_p9)
}
  0x30   : > { %s2373_s29 = smov 128   ;;  %s2375_s13 = smov 8  }
  0x31   : > { %1509 = dma.hbm_to_vmem [thread:$0]  (!%p1978_p6), %s2406_s3, 512, %s1967_s14, [#allocation9], %s2373_s29, %s2373_s29, %s2375_s13  }
  0x32   : > { %s2408_s5 = sld [smem:[#allocation28_spill]] }
  0x38   : > { %s1622_s23 = scalar_lea.hbm %s2408_s5, 512 }
  0x39   : > { %p1623_p4 = scmp.ne.s32.totalorder %s2408_s5, %s1622_s23  ;;  %p1629_p12 = scmp.lt.u32.totalorder %s1622_s23, %s2408_s5 }
  0x3b   : > { %p1625_p10 = pnand %p1623_p4, %p1992_p8 }
  0x3d   : > { %p1626_p11 = pneg %p1625_p10 }
  0x3f   : > { %p1631_p13 = pnand %p1629_p12, %p1626_p11 }
  0x41   : > { %1634 = shalt.err (!%p1631_p13)
}
  0x42   : > { %s1635_s14 = scalar_lea.vmem %s1982_s18, 512  ;;  %p1643_p7 = scmp.lt.s32.totalorder %s1982_s18, %s1982_s18 }
  0x43   : > { %p1636_p0 = scmp.ne.s32.totalorder %s1982_s18, %s1635_s14  ;;  %p1644_p9 = scmp.lt.s32.totalorder %s1635_s14, %s1635_s14 }
  0x45   : > { %p1638_p2 = pnand %p1636_p0, %p1992_p8  ;;  %p1645_p4 = por %p1644_p9, %p1643_p7 }
  0x47   : > { %p1639_p5 = pneg %p1638_p2 }
  0x49   : > { %p1646_p10 = pnand %p1645_p4, %p1639_p5 }
  0x4b   : > { %1649 = shalt.err (!%p1646_p10)
}
  0x4c   : > { %1515 = dma.hbm_to_vmem [thread:$0]  (!%p1978_p6), %s2408_s5, 512, %s1982_s18, [#allocation12], %s2373_s29, %s2373_s29, %s2375_s13  }
  0x4d   : > { %s1328_s21 = sadd.s32 4294967294, %s1874_s12   ;;  %s2044_s22 = sadd.s32 1, %s1874_s12  }
  0x4e   : > { %2409 = sst [smem:[#allocation22_spill]] %s2044_s22  ;;  %s34_s23 = ssub.s32 %s1874_s12, %s2044_s22 }
  0x4f   : > { %s37_s24 = sadd.s32 1, %s1870_s11  ;;  %p35_p11 = scmp.eq.s32.totalorder %s34_s23, 0 }
  0x50   : > { %p44_p12 = scmp.ne.s32.totalorder %s1870_s11, %s1866_s10  ;;  %p45_p13 = scmp.eq.s32.totalorder %s1874_s12, 0 }
  0x51   : > { %p50_p0 = scmp.ne.s32.totalorder %s1866_s10, %s1862_s30  ;;  %p257_p7 = scmp.eq.s32.totalorder %s1962_s15, 1 }
  0x52   : > { %s2055_s26 = scalar_select %p35_p11, %s1870_s11, %s37_s24  }
  0x53   : > { %p46_p2 = por %p45_p13, %p44_p12  ;;  %p2059_p5 = por %p2383_p1, %p50_p0 }
  0x54   : > { %2410 = sst [smem:[#allocation23_spill]] %s2055_s26  ;;  %p263_p9 = scmp.eq.s32.totalorder %s1328_s21, 1 }
  0x55   : > { %s2411_s27 = scalar_select %p2059_p5, 1, 0 }
  0x56   : > { %p1537_p4 = scmp.lt.s32.totalorder %s1874_s12, 2  ;;  %s2377_s18 = sand.u32 1, %s1870_s11  }
  0x57   : > { %p2066_p10 = por %p257_p7, %p44_p12  ;;  %p2070_p3 = por %p263_p9, %p50_p0 }
  0x58   : > { %s2076_s17 = sshll.u32 %s2377_s18, 3  ;;  %s2079_s20 = sshll.u32 %s1874_s12, 7 }
  0x59   : > { %s2412_s28 = scalar_select %p2066_p10, 1, 0 }
  0x5a   : > { %s2414_s14 = scalar_select %p2070_p3, 1, 0 }
  0x5b   : > { %2413 = sst [smem:[#allocation24_spill]] %s2412_s28  ;;  %p2081_p11 = pnand %p1537_p4, %p46_p2 }
  0x5c   : > { %2415 = sst [smem:[#allocation25_spill]] %s2414_s14  ;;  %s356_s21 = sand.u32 1, %s1874_s12  }
  0x5d   : > { %s2416_s23 = scalar_select %p2081_p11, 1, 0 }
  0x5e   : > { %s2417_s1 = sld [smem:[#allocation26_spill]]  ;;  %s360_s18 = scalar_lea.vmem [#allocation5], %s2076_s17 }
  0x5f   : > { %s367_s3 = sshll.u32 %s360_s18, 4  ;;  %s1880_s5 = smov [#allocation10]   ;;  %s2093_s3 = int_to_ptr.vmem [resolvable:$true] %s367_s3 }
  0x60   : > { %s2095_s26 = sshll.u32 %s1880_s5, 4  ;;  %s2097_s22 = scalar_lea.sflag [#allocation6], %s356_s21  ;;  %s296_s26 = int_to_ptr.vmem [resolvable:$true] %s2095_s26 }
  0x61   : > { %p2103_p13 = pneg %p2081_p11 }
  0x63   : > { %s2418_s29 = scalar_select %p2103_p13, 1, 0 }
  0x64   : > { %s2090_s13 = scalar_lea.hbm %s2417_s1, %s2079_s20  ;;  %s1655_s12 = scalar_lea.hbm %s2417_s1, 256 }
  0x65   : > { %s1650_s14 = scalar_lea.hbm %s2090_s13, 128  ;;  %p1656_p7 = scmp.lt.u32.totalorder %s2090_s13, %s2417_s1 }
  0x66   : > { %p1651_p12 = scmp.ne.s32.totalorder %s2090_s13, %s1650_s14  ;;  %p1657_p9 = scmp.lt.u32.totalorder %s1655_s12, %s1650_s14 }
  0x67   : > { %p1659_p1 = scmp.lt.u32.totalorder %s1650_s14, %s2090_s13 }
  0x68   : > { %p1653_p0 = pnand %p2103_p13, %p1651_p12  ;;  %p1658_p4 = por %p1657_p9, %p1656_p7 }
  0x6a   : > { %p1654_p2 = pneg %p1653_p0  ;;  %p1660_p3 = por %p1659_p1, %p1658_p4 }
  0x6c   : > { %p1661_p10 = pnand %p1660_p3, %p1654_p2 }
  0x6e   : > { %1664 = shalt.err (!%p1661_p10)
}
  0x6f   : > { %s1665_s21 = scalar_lea.vmem %s2093_s3, 128  ;;  %s1881_s24 = smov [#allocation5]  }
  0x70   : > { %p1666_p12 = scmp.ne.s32.totalorder %s2093_s3, %s1665_s21  ;;  %s1670_s18 = sshll.u32 %s1881_s24, 4  ;;  %s1671_s18 = int_to_ptr.vmem [resolvable:$false] %s1670_s18 }
  0x71   : > { %s1672_s30 = scalar_lea.vmem %s1671_s18, 256  ;;  %p1673_p6 = scmp.lt.s32.totalorder %s2093_s3, %s1671_s18 }
  0x72   : > { %p1668_p0 = pnand %p1666_p12, %p2103_p13  ;;  %p1674_p8 = scmp.lt.s32.totalorder %s1672_s30, %s1665_s21 }
  0x74   : > { %p1669_p5 = pneg %p1668_p0  ;;  %p1675_p7 = por %p1674_p8, %p1673_p6 }
  0x76   : > { %p1676_p9 = pnand %p1675_p7, %p1669_p5 }
  0x78   : > { %1679 = shalt.err (!%p1676_p9)
}
  0x79   : > { %1525 = dma.hbm_to_vmem [thread:$0]  (!%p2081_p11), %s2090_s13, 128, %s2093_s3, %s2097_s22  }
  0x7a   : > { %s1680_s5 = scalar_lea.hbm %s2366_s4, 512  ;;  %p2419_p3 = scmp.ne.s32.totalorder %s2407_s25, 0 }
  0x7b   : > { %p1681_p1 = scmp.ne.s32.totalorder %s2366_s4, %s1680_s5  ;;  %p1687_p5 = scmp.lt.u32.totalorder %s1680_s5, %s2366_s4 }
  0x7d   : > { %p1683_p6 = pnand %p1681_p1, %p2419_p3 }
  0x7f   : > { %p1684_p8 = pneg %p1683_p6 }
  0x81   : > { %p1689_p10 = pnand %p1687_p5, %p1684_p8 }
  0x83   : > { %1692 = shalt.err (!%p1689_p10)
}
  0x84   : > { %s1693_s30 = scalar_lea.vmem %s296_s26, 512  ;;  %p1701_p0 = scmp.lt.s32.totalorder %s296_s26, %s296_s26 }
  0x85   : > { %p1694_p2 = scmp.ne.s32.totalorder %s296_s26, %s1693_s30  ;;  %p1702_p7 = scmp.lt.s32.totalorder %s1693_s30, %s1693_s30 }
  0x87   : > { %p1696_p4 = pnand %p1694_p2, %p2419_p3  ;;  %p1703_p9 = por %p1702_p7, %p1701_p0 }
  0x89   : > { %p1697_p12 = pneg %p1696_p4 }
  0x8b   : > { %p1704_p11 = pnand %p1703_p9, %p1697_p12 }
  0x8d   : > { %1707 = shalt.err (!%p1704_p11)
}
  0x8e   : > { %p2420_p1 = scmp.ne.s32.totalorder %s2405_s19, 0  ;;  %s2421_s1 = smov 8  }
  0x8f   : > { %s2422_s3 = smov 128   ;;  %s1882_s14 = smov [#allocation13]  }
  0x90   : > { %1512 = dma.hbm_to_vmem [thread:$0]  (!%p2420_p1), %s2366_s4, 512, %s296_s26, [#allocation9], %s2422_s3, %s2422_s3, %s2421_s1  }
  0x91   : > { %s321_s5 = sshll.u32 %s1882_s14, 4  ;;  %s1708_s18 = scalar_lea.hbm %s2368_s6, 512  ;;  %s322_s5 = int_to_ptr.vmem [resolvable:$true] %s321_s5 }
  0x92   : > { %p1709_p11 = scmp.ne.s32.totalorder %s2368_s6, %s1708_s18  ;;  %p1715_p5 = scmp.lt.u32.totalorder %s1708_s18, %s2368_s6 }
  0x94   : > { %p1711_p6 = pnand %p1709_p11, %p2419_p3 }
  0x96   : > { %p1712_p8 = pneg %p1711_p6 }
  0x98   : > { %p1717_p10 = pnand %p1715_p5, %p1712_p8 }
  0x9a   : > { %1720 = shalt.err (!%p1717_p10)
}
  0x9b   : > { %s1721_s26 = scalar_lea.vmem %s322_s5, 512  ;;  %p1729_p0 = scmp.lt.s32.totalorder %s322_s5, %s322_s5 }
  0x9c   : > { %p1722_p2 = scmp.ne.s32.totalorder %s322_s5, %s1721_s26  ;;  %p1730_p7 = scmp.lt.s32.totalorder %s1721_s26, %s1721_s26 }
  0x9e   : > { %p1724_p4 = pnand %p1722_p2, %p2419_p3  ;;  %p1731_p9 = por %p1730_p7, %p1729_p0 }
  0xa0   : > { %p1725_p12 = pneg %p1724_p4 }
  0xa2   : > { %p1732_p13 = pnand %p1731_p9, %p1725_p12 }
  0xa4   : > { %1735 = shalt.err (!%p1732_p13)
}
  0xa5   : > { %1518 = dma.hbm_to_vmem [thread:$0]  (!%p2420_p1), %s2368_s6, 512, %s322_s5, [#allocation12], %s2422_s3, %s2422_s3, %s2421_s1  }
  0xa6   : > { %s2174_s13 = scalar_lea.hbm %s2362_s0, %s2079_s20  ;;  %s342_s19 = scalar_lea.vmem [#allocation2], %s2076_s17 }
  0xa7   : > { %s349_s12 = sshll.u32 %s342_s19, 4  ;;  %s2423_s14 = sand.u32 1, %s1870_s11   ;;  %s350_s12 = int_to_ptr.vmem [resolvable:$true] %s349_s12 }
  0xa8   : > { %s339_s24 = scalar_lea.sflag [#allocation3], %s2423_s14  ;;  %s1736_s21 = scalar_lea.hbm %s2174_s13, 128 }
  0xa9   : > { %p1737_p13 = scmp.ne.s32.totalorder %s2174_s13, %s1736_s21  ;;  %p2424_p3 = scmp.ne.s32.totalorder %s2418_s29, 0 }
  0xaa   : > { %s1741_s5 = scalar_lea.hbm %s2362_s0, 256  ;;  %p1742_p1 = scmp.lt.u32.totalorder %s2174_s13, %s2362_s0 }
  0xab   : > { %p1739_p11 = pnand %p1737_p13, %p2424_p3  ;;  %p1743_p8 = scmp.lt.u32.totalorder %s1741_s5, %s1736_s21 }
  0xac   : > { %p1745_p10 = scmp.lt.u32.totalorder %s1736_s21, %s2174_s13 }
  0xad   : > { %p1740_p6 = pneg %p1739_p11  ;;  %p1744_p5 = por %p1743_p8, %p1742_p1 }
  0xaf   : > { %p1746_p2 = por %p1745_p10, %p1744_p5 }
  0xb1   : > { %p1747_p4 = pnand %p1746_p2, %p1740_p6 }
  0xb3   : > { %1750 = shalt.err (!%p1747_p4)
}
  0xb4   : > { %s1751_s26 = scalar_lea.vmem %s350_s12, 128  ;;  %s1883_s7 = smov [#allocation2]  }
  0xb5   : > { %p1752_p12 = scmp.ne.s32.totalorder %s350_s12, %s1751_s26  ;;  %s1756_s9 = sshll.u32 %s1883_s7, 4  ;;  %s1757_s9 = int_to_ptr.vmem [resolvable:$false] %s1756_s9 }
  0xb6   : > { %s1758_s25 = scalar_lea.vmem %s1757_s9, 256  ;;  %p1759_p9 = scmp.lt.s32.totalorder %s350_s12, %s1757_s9 }
  0xb7   : > { %p1754_p0 = pnand %p1752_p12, %p2424_p3  ;;  %p1760_p13 = scmp.lt.s32.totalorder %s1758_s25, %s1751_s26 }
  0xb9   : > { %p1755_p7 = pneg %p1754_p0  ;;  %p1761_p11 = por %p1760_p13, %p1759_p9 }
  0xbb   : > { %p1762_p1 = pnand %p1761_p11, %p1755_p7 }
  0xbd   : > { %1765 = shalt.err (!%p1762_p1)
}
  0xbe   : > { %p2425_p8 = scmp.ne.s32.totalorder %s2416_s23, 0  ;;  %s2200_s14 = scalar_lea.hbm %s2364_s2, %s2079_s20 }
  0xbf   : > { %s378_s21 = scalar_lea.vmem [#allocation7], %s2076_s17  ;;  %s1766_s3 = scalar_lea.hbm %s2200_s14, 128 }
  0xc0   : > { %1522 = dma.hbm_to_vmem [thread:$0]  (!%p2425_p8), %s2174_s13, 128, %s350_s12, %s339_s24  }
  0xc1   : > { %s385_s1 = sshll.u32 %s378_s21, 4  ;;  %p1767_p6 = scmp.ne.s32.totalorder %s2200_s14, %s1766_s3  ;;  %s386_s1 = int_to_ptr.vmem [resolvable:$true] %s385_s1 }
  0xc2   : > { %s1771_s13 = scalar_lea.hbm %s2364_s2, 256  ;;  %p1772_p2 = scmp.lt.u32.totalorder %s2200_s14, %s2364_s2 }
  0xc3   : > { %p1769_p5 = pnand %p1767_p6, %p2424_p3  ;;  %p1773_p4 = scmp.lt.u32.totalorder %s1771_s13, %s1766_s3 }
  0xc4   : > { %p1775_p0 = scmp.lt.u32.totalorder %s1766_s3, %s2200_s14 }
  0xc5   : > { %p1770_p10 = pneg %p1769_p5  ;;  %p1774_p12 = por %p1773_p4, %p1772_p2 }
  0xc7   : > { %p1776_p7 = por %p1775_p0, %p1774_p12 }
  0xc9   : > { %p1777_p9 = pnand %p1776_p7, %p1770_p10 }
  0xcb   : > { %1780 = shalt.err (!%p1777_p9)
}
  0xcc   : > { %s1781_s17 = scalar_lea.vmem %s386_s1, 128  ;;  %s1884_s20 = smov [#allocation7]  }
  0xcd   : > { %p1782_p13 = scmp.ne.s32.totalorder %s386_s1, %s1781_s17  ;;  %s1786_s30 = sshll.u32 %s1884_s20, 4  ;;  %s1787_s30 = int_to_ptr.vmem [resolvable:$false] %s1786_s30 }
  0xce   : > { %s1788_s26 = scalar_lea.vmem %s1787_s30, 256  ;;  %p1789_p6 = scmp.lt.s32.totalorder %s386_s1, %s1787_s30 }
  0xcf   : > { %p1784_p11 = pnand %p1782_p13, %p2424_p3  ;;  %p1790_p5 = scmp.lt.s32.totalorder %s1788_s26, %s1781_s17 }
  0xd1   : > { %p1785_p1 = pneg %p1784_p11  ;;  %p1791_p8 = por %p1790_p5, %p1789_p6 }
  0xd3   : > { %p1792_p2 = pnand %p1791_p8, %p1785_p1 }
  0xd5   : > { %1795 = shalt.err (!%p1792_p2)
}
  0xd6   : > { %p2426_p4 = scmp.ne.s32.totalorder %s2416_s23, 0  ;;  %p2427_p10 = scmp.ne.s32.totalorder %s2404_s16, 0 }
  0xd7   : > { %s2224_s29 = sand.u32 (!%p2427_p10), 1, %s1866_s10   ;;  %p2428_p3 = scmp.ne.s32.totalorder (!%p2427_p10), %s2411_s27, 0 }
  0xd8   : > { %1528 = dma.hbm_to_vmem [thread:$0]  (!%p2426_p4), %s2200_s14, 128, %s386_s1, %s2097_s22  }
  0xd9   : > { %401 = sbr.rel (%p2427_p10) target bundleno = 2073 (0x819), region = 56  ;;  %s2227_s7 = sshll.u32 (!%p2427_p10), %s2224_s29, 3 }
  0xda   : > { %s404_s9 = scalar_lea.sflag (!%p2427_p10), [#allocation3], %s2224_s29  ;;  %s407_s25 = scalar_lea.vmem (!%p2427_p10), [#allocation2], %s2227_s7 }
  0xe0   : > { %1841 = dma.done.wait (%p2428_p3), %s404_s9, 128  }
  0xe1   : > { %1843 = vsyncadd (%p2428_p3), %s404_s9, 4294967168  ;;  %s412_s16 = sand.u32 1, %s1962_s15   ;;  %s416_s23 = scalar_lea.vmem [#allocation5], %s2227_s7 }
  0xe2   : > { %s413_s22 = scalar_lea.sflag [#allocation6], %s412_s16 }
  0xe3   : > { %1845 = dma.done.wait (%p2428_p3), %s413_s22, 256  }
  0xe4   : > { %1847 = vsyncadd (%p2428_p3), %s413_s22, 4294967040  ;;  %s425_s28 = scalar_lea.vmem [#allocation7], %s2227_s7  ;;  %p2429_p8 = scmp.eq.s32.totalorder %s1962_s15, 0 }
  0xe6   : > { %1849 = dma.done.wait (%p2429_p8), [#allocation9], 1024   ;;  %p2430_p12 = pmov %p2429_p8 }
  0xe7   : > { %p2431_p0 = pmov %p2429_p8 }
  0xe8   : > { %1851 = vsyncadd (%p2430_p12), [#allocation9], 4294966272 }
  0xe9   : > { %1853 = dma.done.wait (%p2431_p0), [#allocation12], 1024   ;;  %p2432_p7 = pmov %p2431_p0 }
  0xea   : > { %v1885_v0 = vmov 0.0|0.0   ;;  %vm1886_vm0 = vmmov 0   ;;  %v1887_v1 = vmov 0.0   ;;  %v575_v2 = vld [vmem:[#allocation10] sm:$0xff]  ;;  %v576_v3 = vld [vmem:[#allocation10 + $0x8] sm:$0xff]  ;;  %v577_v7 = vld [vmem:[#allocation10 + $0x10] sm:$0xff] }
  0xeb   : > { %1855 = vsyncadd (%p2432_p7), [#allocation12], 4294966272  ;;  %1464 = vmatprep.subr.bf16.mxu1 %v1885_v0  ;;  %1458 = vmatprep.subr.bf16.mxu0 %v1885_v0  ;;  %v497_v4 = vld [vmem:[#allocation8] sm:$0xff]  ;;  %v1465_v5 = vpack.c.bf16 %v576_v3, %v575_v2  ;;  %v498_v6 = vld [vmem:[#allocation8 + $0x8] sm:$0xff]  ;;  %vm501_vm1 = vcmask 261120   ;;  %vm731_vm2 = vcmask 130048  }
  0xec   : > { %1413 = vmatprep.mubr.msk.f32.mxu1 %vm1886_vm0, %v1887_v1  ;;  %1402 = vmatprep.mubr.msk.f32.mxu0 %vm1886_vm0, %v1887_v1  ;;  %v578_v8 = vld [vmem:[#allocation10 + $0x18] sm:$0xff]  ;;  %v1459_v9 = vpack.c.bf16 %v498_v6, %v497_v4  ;;  %v499_v10 = vld [vmem:[#allocation8 + $0x10] sm:$0xff]  ;;  %v495_v14 = vld [vmem:[%s416_s23] sm:$0xff]  ;;  %s1888_s27 = smov 112   ;;  %p490_p9 = scmp.lt.s32.totalorder %s1962_s15, 1  ;;  %vm809_vm4 = vcmask 64512  }
  0xed   : > { %v500_v11 = vld [vmem:[#allocation8 + $0x18] sm:$0xff]  ;;  %1466 = vmatpush3.bf16.msra.mxu1 %v1465_v5  ;;  %v1468_v12 = vpack.c.bf16 %v578_v8, %v577_v7  ;;  %v652_v20 = vld [vmem:[#allocation11] sm:$0xff]  ;;  %v653_v21 = vld [vmem:[#allocation11 + $0x8] sm:$0xff]  ;;  %s1889_s5 = smov 16   ;;  %s2433_s18 = sld [smem:[#allocation24_spill]] }
  0xee   : > { %1460 = vmatpush3.bf16.msra.mxu0 %v1459_v9  ;;  %1467 = vmatprep.subr.bf16.mxu1 %v1885_v0  ;;  %v1462_v13 = vpack.c.bf16 %v500_v11, %v499_v10  ;;  %v494_v15 = vld [vmem:[%s407_s25] sm:$0xff]  ;;  %v1471_v23 = vpack.c.bf16 %v653_v21, %v652_v20  ;;  %s491_s19 = scalar_select %p490_p9, %s1962_s15, 1  ;;  %v1066_v59 = vld [vmem:[#allocation13] sm:$0xff]  ;;  %v1067_v60 = vld [vmem:[#allocation13 + $0x8] sm:$0xff] }
  0xef   : > { %1461 = vmatprep.subr.bf16.mxu0 %v1885_v0  ;;  %v654_v22 = vld [vmem:[#allocation11 + $0x10] sm:$0xff]  ;;  %v655_v24 = vld [vmem:[#allocation11 + $0x18] sm:$0xff]  ;;  %v1477_v62 = vpack.c.bf16 %v1067_v60, %v1066_v59  ;;  %s2434_s24 = sld [smem:[#allocation29_spill]]  ;;  %s1363_s17 = sshll.u32 %s1962_s15, 7 }
  0xf0   : > { %v1474_v25 = vpack.c.bf16 %v655_v24, %v654_v22  ;;  %v496_v26 = vld [vmem:[%s425_s28] sm:$0xff]  ;;  %s1350_s14 = sshll.u32 %s491_s19, 3  ;;  %s489_s20 = scalar_lea.vmem [#allocation14], %s2227_s7 }
  0xf1   : > { %1469 = vmatpush3.bf16.msra.mxu1 %v1468_v12  ;;  %s493_s3 = scalar_lea.vmem %s2370_s8, %s1350_s14  ;;  %v1068_v61 = vld [vmem:[#allocation13 + $0x10] sm:$0xff]  ;;  %v1069_v63 = vld [vmem:[#allocation13 + $0x18] sm:$0xff]  ;;  %s1165_s30 = sshll.u32 %s489_s20, 4  ;;  %s2319_s30 = int_to_ptr.vmem [resolvable:$true] %s1165_s30 }
  0xf2   : > { %1463 = vmatpush3.bf16.msra.mxu0 %v1462_v13  ;;  %1427 = vmatprep.subr.mxu1 %v1887_v1  ;;  %v729_v27 = vld [vmem:[%s493_s3] sm:$0xff]  ;;  %s2435_s25 = sld [smem:[#allocation30_spill]]  ;;  %s1152_s22 = scalar_lea.sflag [#allocation4], %s2224_s29 }
  0xf3   : > { %1470 = vmatprep.subr.bf16.mxu0 %v1885_v0  ;;  %vm730_vm3 = vcmp.eq.s32.totalorder %v729_v27, 0  ;;  %s1796_s23 = scalar_lea.vmem %s2319_s30, 128  ;;  %p2436_p11 = scmp.ne.s32.totalorder %s2433_s18, 0 }
  0xf4   : > { %1414 = vmatmul.mubr.msk.f32.vlgmr.msra.gmra.mrb[0].mxu1 %vm501_vm1, %v495_v14  ;;  %p1797_p13 = scmp.ne.s32.totalorder %s2319_s30, %s1796_s23  ;;  %s1890_s15 = smov [#allocation14]  }
  0xf5   : > { %1403 = vmatmul.mubr.msk.f32.vlgmr.msra.gmra.mrb[0].mxu0 %vm501_vm1, %v494_v15  ;;  %1429 = vmatprep.mubr.msk.f32.mxu1 %vm1886_vm0, %v1887_v1  ;;  %v1360_v6 = vld [vmem:[%s2434_s24] ss:$0 sm:$0xff]  ;;  %s1800_s7 = sshll.u32 %s1890_s15, 4  ;;  %s1801_s7 = int_to_ptr.vmem [resolvable:$false] %s1800_s7 }
  0xf6   : > { %1424 = vmatprep.mubr.msk.f32.mxu0 %vm1886_vm0, %v1887_v1  ;;  %1472 = vmatpush3.bf16.msra.mxu0 %v1471_v23  ;;  %p1798_p1 = pnand %p1797_p13, %p2436_p11  ;;  %s1802_s28 = scalar_lea.vmem %s1801_s7, 256 }
  0xf7   : > { %1473 = vmatprep.subr.bf16.mxu0 %v1885_v0  ;;  %p1803_p5 = scmp.lt.s32.totalorder %s2319_s30, %s1801_s7  ;;  %p1804_p2 = scmp.lt.s32.totalorder %s1802_s28, %s1796_s23 }
  0xf8   : > { %s2317_s16 = scalar_lea.hbm %s2435_s25, %s1363_s17  ;;  %p1799_p6 = pneg %p1798_p1 }
  0xf9   : > { %p1805_p4 = por %p1804_p2, %p1803_p5 }
  0xfa   : > { %1475 = vmatpush3.bf16.msra.mxu0 %v1474_v25 }
  0xfb   : > { %1476 = vmatprep.subr.bf16.mxu0 %v1885_v0  ;;  %p1806_p10 = pnand %p1805_p4, %p1799_p6 }
  0xfd   : > { %1425 = vmatmul.mubr.msk.f32.vlgmr.msra.gmra.mrb[2].mxu0 %vm501_vm1, %v496_v26 }
  0xfe   : > { %1455 = vmatprep.mubr.msk.f32.mxu0 %vm1886_vm0, %v1887_v1  ;;  %1478 = vmatpush3.bf16.msra.mxu0 %v1477_v62 }
  0xff   : > { %1479 = vmatprep.subr.bf16.mxu0 %v1885_v0 }
 0x1c7   : > { %v648_v16 = vpop.f32.mrb[0].mxu1 }
 0x1c8   : > { %896 = vrot.lane.b32.xlu1 %v648_v16, %s1888_s27  ;;  %v1415_v17 = vpop.f32.mrb[1].mxu1  ;;  %1428 = vmatpush3.xpose.msk.msra.mxu1 %vm731_vm2, %v648_v16  ;;  %v571_v18 = vpop.f32.mrb[0].mxu0 }
 0x1c9   : > { %v1404_v19 = vpop.f32.mrb[1].mxu0  ;;  %1432 = vmatprep.subr.mxu1 %v1887_v1 }
 0x1cb   : > { %1430 = vmatmul.mubr.msk.f32.vlgmr.msra.gmra.mrb[2].mxu1 %vm731_vm2, %v571_v18 }
 0x1cc   : > { %894 = vrot.lane.b32.xlu1 %v571_v18, %s1888_s27  ;;  %1434 = vmatprep.mubr.msk.f32.mxu1 %vm1886_vm0, %v1887_v1 }
 0x1d0   : > { %v725_v37 = vpop.f32.mrb[2].mxu0 }
 0x1d1   : > { %v1426_v38 = vpop.f32.mrb[3].mxu0  ;;  %1433 = vmatpush3.msra.mxu1 %v725_v37 }
 0x1d2   : > { %1437 = vmatprep.subr.mxu1 %v1887_v1 }
 0x23a   : > { %v897_v41 = vpop.permute.xlu1 %896 }
 0x23e   : > { %v895_v43 = vpop.permute.xlu1 %894 }
 0x29e   : > { %v804_v28 = vpop.f32.mrb[2].mxu1 }
 0x29f   : > { %v808_v29 = vsel %vm730_vm3, -1.767767e+19, %v804_v28  ;;  %v1431_v30 = vpop.f32.mrb[3].mxu1 }
 0x2a0   : > { %v810_v31 = vsel %vm809_vm4, %v808_v29, -inf }
 0x2a1   : > { %811 = vmax.xlane.f32.xlu0 %v810_v31 }
 0x32e   : > { %v812_v32 = vpop.xlane.xlu0 %811 }
 0x32f   : > { %v813_v33 = vsub.f32 %v808_v29, %v812_v32 }
 0x331   : > { %v814_v34 = vmul.f32 1.442695, %v813_v33 }
 0x333   : > { %1586 = vpow2.f32 %v814_v34 }
 0x33d   : > { %v1587_v35 = vpop.eup %1586 }
 0x33e   : > { %v816_v36 = vsel %vm809_vm4, %v1587_v35, 0.0 }
 0x33f   : > { %817 = vadd.xlane.f32.xlu0 %v816_v36 }
 0x3cc   : > { %v818_v39 = vpop.xlane.xlu0 %817 }
 0x3cd   : > { %1588 = vrcp.f32 %v818_v39 }
 0x3d7   : > { %v1589_v40 = vpop.eup %1588 }
 0x3d8   : > { %v820_v42 = vmul.f32 %v1589_v40, %v1587_v35 }
 0x3da   : > { %1435 = vmatmul.mubr.msk.f32.vlgmr.msra.gmra.mrb[4].mxu1 %vm809_vm4, %v820_v42 }
 0x3db   : > { %1438 = vmatpush3.xpose.msk.msra.mxu1 %vm731_vm2, %v897_v41  ;;  %1439 = vmatprep.mubr.msk.f32.mxu1 %vm1886_vm0, %v1887_v1 }
 0x3dc   : > { %1442 = vmatprep.subr.mxu1 %v1887_v1 }
 0x3de   : > { %1440 = vmatmul.mubr.msk.f32.vlgmr.msra.gmra.mrb[6].mxu1 %vm731_vm2, %v895_v43 }
 0x3df   : > { %1444 = vmatprep.mubr.msk.f32.mxu1 %vm1886_vm0, %v1887_v1  ;;  %v1480_v1 = vpack.c.bf16 %v1069_v63, %v1068_v61 }
 0x3e1   : > { %1481 = vmatpush3.bf16.msra.mxu0 %v1480_v1 }
 0x4ad   : > { %v890_v44 = vpop.f32.mrb[4].mxu1 }
 0x4ae   : > { %v1436_v45 = vpop.f32.mrb[5].mxu1 }
 0x4b1   : > { %v968_v46 = vpop.f32.mrb[6].mxu1 }
 0x4b2   : > { %v972_v47 = vsel %vm730_vm3, -1.767767e+19, %v968_v46  ;;  %v1441_v48 = vpop.f32.mrb[7].mxu1 }
 0x4b3   : > { %v973_v49 = vsel %vm809_vm4, %v972_v47, -inf }
 0x4b4   : > { %974 = vmax.xlane.f32.xlu0 %v973_v49 }
 0x4ca   : > { %985 = vrot.lane.b32.xlu0 %v725_v37, %s1888_s27 }
 0x541   : > { %v975_v50 = vpop.xlane.xlu0 %974 }
 0x542   : > { %v976_v51 = vsub.f32 %v972_v47, %v975_v50 }
 0x544   : > { %v977_v52 = vmul.f32 1.442695, %v976_v51 }
 0x545   : > { %v986_v53 = vpop.permute.xlu0 %985 }
 0x546   : > { %1590 = vpow2.f32 %v977_v52  ;;  %1443 = vmatpush3.msra.mxu1 %v986_v53 }
 0x550   : > { %v1591_v54 = vpop.eup %1590 }
 0x551   : > { %v979_v55 = vsel %vm809_vm4, %v1591_v54, 0.0 }
 0x552   : > { %980 = vadd.xlane.f32.xlu1 %v979_v55 }
 0x5df   : > { %v981_v56 = vpop.xlane.xlu1 %980 }
 0x5e0   : > { %1592 = vrcp.f32 %v981_v56 }
 0x5ea   : > { %v1593_v57 = vpop.eup %1592 }
 0x5eb   : > { %v983_v58 = vmul.f32 %v1593_v57, %v1591_v54 }
 0x5ed   : > { %1445 = vmatmul.mubr.msk.f32.vlgmr.msra.gmra.mrb[8].mxu1 %vm809_vm4, %v983_v58 }
 0x6c0   : > { %v1057_v2 = vpop.f32.mrb[8].mxu1 }
 0x6c1   : > { %1062 = vrot.lane.b32.xlu0 %v1057_v2, %s1889_s5  ;;  %v1446_v3 = vpop.f32.mrb[9].mxu1 }
 0x733   : > { %v1063_v4 = vpop.permute.xlu0 %1062 }
 0x734   : > { %v1065_v5 = vsel %vm731_vm2, %v890_v44, %v1063_v4 }
 0x735   : > { %1456 = vmatmul.mubr.msk.f32.vlgmr.msra.gmra.mrb[4].mxu0 %vm501_vm1, %v1065_v5 }
 0x808   : > { %v1146_v0 = vpop.f32.mrb[4].mxu0 }
 0x809   : > { %v1147_v7 = vadd.f32 %v1360_v6, %v1146_v0  ;;  %v1457_v8 = vpop.f32.mrb[5].mxu0 }
 0x80b   : > { %1150 = vst.msk [vmem:[%s489_s20] sm:$0xff] %vm501_vm1, %v1147_v7 }
 0x80c   : > { %1809 = shalt.err (!%p1806_p10)
}
 0x80d   : > { %s1810_s29 = scalar_lea.hbm %s2317_s16, 128  ;;  %s1814_s14 = scalar_lea.hbm %s2435_s25, 256 }
 0x80e   : > { %p1811_p3 = scmp.ne.s32.totalorder %s2317_s16, %s1810_s29  ;;  %p1815_p0 = scmp.lt.u32.totalorder %s2317_s16, %s2435_s25 }
 0x80f   : > { %p1816_p7 = scmp.lt.u32.totalorder %s1814_s14, %s1810_s29  ;;  %p1818_p13 = scmp.lt.u32.totalorder %s1810_s29, %s2317_s16 }
 0x810   : > { %p1812_p8 = pnand %p1811_p3, %p2436_p11 }
 0x811   : > { %p1817_p9 = por %p1816_p7, %p1815_p0 }
 0x812   : > { %p1813_p12 = pneg %p1812_p8 }
 0x813   : > { %p1819_p1 = por %p1818_p13, %p1817_p9 }
 0x815   : > { %p1820_p6 = pnand %p1819_p1, %p1813_p12 }
 0x817   : > { %1823 = shalt.err (!%p1820_p6)
}
 0x818   : > { %1504 = dma.vmem_to_hbm [thread:$0]  (%p2436_p11), %s2319_s30, 128, %s2317_s16, %s1152_s22  }
 0x819 PF: > { %s2437_s3 = sld [smem:[#allocation20_spill]]  ;;  %s2438_s5 = sld [smem:[#allocation25_spill]] }
 0x81a   : > { %s2439_s13 = sld [smem:[#allocation21_spill]] }
 0x81f   : > { %s1177_s12 = sand.u32 1, %s2437_s3   ;;  %p2440_p5 = scmp.ne.s32.totalorder %s2438_s5, 0 }
 0x820   : > { %p2441_p2 = scmp.ge.s32.totalorder %s2439_s13, 2  ;;  %s1178_s24 = scalar_lea.sflag [#allocation4], %s1177_s12 }
 0x822   : > { %p1530_p4 = pnand %p2441_p2, %p2440_p5 }
 0x824   : > { %1857 = dma.done.wait (!%p1530_p4), %s1178_s24, 128  }
 0x825   : > { %1859 = vsyncadd (!%p1530_p4), %s1178_s24, 4294967168  ;;  %s2442_s12 = sld [smem:[#allocation22_spill]]  ;;  %s2443_s17 = sld [smem:[#allocation23_spill]] }
 0x826   : > { %s2444_s30 = smov %s1866_s10  ;;  %s2445_s10 = smov %s1870_s11 }
 0x82b   : > { %p27_p10 = scmp.ge.s32.totalorder %s2442_s12, 4   ;;  %s2446_s11 = smov %s2443_s17 }
 0x82d   :  { %29 = sbr.rel (!%p27_p10) target bundleno = 15 (0xf), region = 144 }
 0x834   :  { %1183 = vsyncpa [#allocation3], 1 }
 0x835   :  { %1185 = vsyncpa [#allocation3 + $0x1], 1 }
 0x836   :  { %1186 = vsyncpa [#allocation6], 1 }
 0x837   :  { %1188 = vsyncpa [#allocation6 + $0x1], 1 }
 0x838   :  { %1189 = vsyncpa [#allocation9], 1 }
 0x839   :  { %1190 = vsyncpa [#allocation12], 1 }
 0x83a   :  { %1191 = vsyncpa [#allocation4], 1 }
 0x83b   :  { %1193 = vsyncpa [#allocation4 + $0x1], 1 }

</bundles_post_ra>
